<compile_context>
chip_gen: v6e
topology: v6e:2x2x1
jax: 0.10.0
libtpu: 0.0.40
codegen_flags: <defaults>
</compile_context>

<pallas_src>
import numpy as np
import jax
import jax.numpy as jnp
from jax.experimental import pallas as pl
from jax.experimental.pallas import tpu as pltpu


def bilinear_weight_matrix(out_size: int, in_size: int) -> np.ndarray:
    """Dense 1-D bilinear interpolation matrix (out_size, in_size) matching
    PyTorch F.interpolate(mode='bilinear', align_corners=False) semantics."""
    dst = np.arange(out_size, dtype=np.float64)
    scale = in_size / out_size
    src = (dst + 0.5) * scale - 0.5
    src = np.maximum(src, 0.0)                       # PyTorch clamps negative src to 0
    i0 = np.minimum(np.floor(src).astype(np.int64), in_size - 1)
    i1 = np.minimum(i0 + 1, in_size - 1)
    frac = src - i0
    w = np.zeros((out_size, in_size), dtype=np.float32)
    rows = np.arange(out_size)
    w[rows, i0] += (1.0 - frac).astype(np.float32)
    w[rows, i1] += frac.astype(np.float32)
    return w


def _vmem_capacity_bytes() -> int:
    try:
        return int(pltpu.get_tpu_info().vmem_capacity_bytes)
    except Exception:
        return 64 << 20                              # conservative (v7x physical VMEM / TC)


def _footprint_bytes(th, c, h_in, w_in, w_out, h_out, in_item, out_item) -> int:
    """Total VMEM footprint of one grid step, counting Pallas double-buffering."""
    out_blk = th * c * w_out * out_item
    in_blk = c * h_in * w_in * in_item
    wh = h_out * h_in * 4
    wwt = w_in * w_out * 4
    return 2 * (out_blk + in_blk + wh + wwt)


def _pick_tile_h(h_out, c, h_in, w_in, w_out, in_item, out_item, budget) -> int:
    """Largest divisor TH of H_out whose total (double-buffered) footprint fits
    `budget`; TH is kept sublane-aligned unless it is the full extent."""
    sub = 8 * max(1, 4 // max(1, out_item))          # 8 (f32) / 16 (bf16) / 32 (int8)
    divisors = sorted((d for d in range(1, h_out + 1) if h_out % d == 0), reverse=True)
    aligned = [d for d in divisors if d == h_out or d % sub == 0]
    for th in aligned:
        if _footprint_bytes(th, c, h_in, w_in, w_out, h_out, in_item, out_item) <= budget:
            return th
    # Nothing fits: the per-image input block dominates and can't be shrunk here;
    # take the smallest legal tile (never a tile-shape compile error).
    return aligned[-1] if aligned else h_out


def bilinear_resize_kernel(x_ref, wh_ref, wwt_ref, o_ref):
    # x_ref  : (1, C, H_in, W_in)   one NCHW image, native dtype
    # wh_ref : (H_out, H_in)        full H-interp matrix (f32), VMEM-resident
    # wwt_ref: (W_in, W_out)        W-interp matrix, pre-transposed (f32), resident
    # o_ref  : (1, TH, C*W_out)     rows = h_out; lanes = (c-major, w_out-minor)
    _, th, _ = o_ref.shape
    _, c, _h_in, _w_in = x_ref.shape
    w_out = wwt_ref.shape[1]

    # Wh stays resident across the whole grid; slice this tile's rows in-kernel.
    h0 = pl.multiple_of(pl.program_id(1) * th, th)
    wh_t = wh_ref[pl.ds(h0, th), :]                  # (TH, H_in) f32
    wwt = wwt_ref[...]                               # (W_in, W_out) f32

    # Static unroll over channels (C = number of parsing classes, small).
    for ci in range(c):
        xc = x_ref[0, ci].astype(jnp.float32)        # (H_in, W_in)
        u = jnp.dot(wh_t, xc,
                    preferred_element_type=jnp.float32)        # (TH, W_in)
        oc = jnp.dot(u, wwt,
                     preferred_element_type=jnp.float32)       # (TH, W_out)
        # Static lane slice of the (TH, C*W_out) block.  Whenever W_out is a
        # multiple of 128 (always true at segmentation scale) these stores are
        # dense unmasked vst; at toy W_out they are masked but negligible.
        o_ref[0, :, ci * w_out:(ci + 1) * w_out] = oc.astype(o_ref.dtype)


def parsing_output(x: jax.Array, out_size=(32, 32)) -> jax.Array:
    """ParsingOutput.forward: bilinear resize (align_corners=False) of an NCHW
    map to `out_size`, returned as NHWC."""
    N, C, H_in, W_in = x.shape
    H_out, W_out = out_size

    # Exact f32 interpolation weights (kept f32 even for bf16 inputs).
    wh = jnp.asarray(bilinear_weight_matrix(H_out, H_in))        # (H_out, H_in)
    wwt = jnp.asarray(bilinear_weight_matrix(W_out, W_in).T)     # (W_in, W_out)

    in_item = jnp.dtype(x.dtype).itemsize
    out_item = in_item
    vmem_cap = _vmem_capacity_bytes()
    budget = vmem_cap // 2                     # headroom for Mosaic internal scratch
    TH = _pick_tile_h(H_out, C, H_in, W_in, W_out, in_item, out_item, budget)
    footprint = _footprint_bytes(TH, C, H_in, W_in, W_out, H_out, in_item, out_item)
    vmem_limit = int(min(0.85 * vmem_cap, max(32 << 20, 2 * footprint)))

    grid = (N, H_out // TH)

    flops = 2 * N * C * H_out * (H_in * W_in + W_in * W_out)     # separable, H-first
    bytes_accessed = (x.size * in_item
                      + N * H_out * C * W_out * out_item
                      + (H_out * H_in + W_in * W_out) * 4)

    y = pl.pallas_call(
        bilinear_resize_kernel,
        out_shape=jax.ShapeDtypeStruct((N, H_out, C * W_out), x.dtype),
        grid_spec=pltpu.PrefetchScalarGridSpec(
            num_scalar_prefetch=0,
            grid=grid,
            in_specs=[
                # Whole NCHW image per batch element; constant block index along
                # h -> DMA'd once per n, reused across all H_out tiles.
                pl.BlockSpec((1, C, H_in, W_in), lambda n, h: (n, 0, 0, 0)),
                # Full weight matrices, constant block index -> VMEM-resident.
                pl.BlockSpec((H_out, H_in), lambda n, h: (0, 0)),
                pl.BlockSpec((W_in, W_out), lambda n, h: (0, 0)),
            ],
            out_specs=pl.BlockSpec((1, TH, C * W_out), lambda n, h: (n, h, 0)),
        ),
        compiler_params=pltpu.CompilerParams(
            # No cross-step accumulation and disjoint output blocks: both axes
            # are legally parallel (lets v7x use both TensorCores even for N=1).
            dimension_semantics=("parallel", "parallel"),
            vmem_limit_bytes=vmem_limit,
        ),
        cost_estimate=pl.CostEstimate(
            flops=flops, transcendentals=0, bytes_accessed=bytes_accessed),
    )(x, wh, wwt)

    # (N, H_out, C*W_out) has the memory layout of (N, H_out, C, W_out): free reshape.
    y = y.reshape(N, H_out, C, W_out)
    # TODO(synk): final NHWC permute remains a wrapper XLA copy over the upsampled map;
    # an in-kernel channel-minor lane interleave needs a 3-D minor transpose Mosaic
    # does not lower robustly yet.
    return jnp.transpose(y, (0, 1, 3, 2))


if __name__ == "__main__":
    key = jax.random.PRNGKey(0)
    # Small shapes consistent with the module: NCHW input, upsample 16x16 -> 32x32.
    N, C, H_in, W_in = 2, 4, 16, 16
    out_size = (32, 32)
    x = jax.random.normal(key, (N, C, H_in, W_in), dtype=jnp.float32)

    y = jax.block_until_ready(parsing_output(x, out_size))
    assert y.shape == (N, out_size[0], out_size[1], C), y.shape

    # Plain-JAX reference using the same separable formulation.
    wh = jnp.asarray(bilinear_weight_matrix(out_size[0], H_in))
    ww = jnp.asarray(bilinear_weight_matrix(out_size[1], W_in))
    ref = jnp.einsum('oh,nchw,vw->novc', wh, x, ww)
    np.testing.assert_allclose(np.asarray(y), np.asarray(ref), rtol=1e-5, atol=1e-5)

    print("KERNEL_OK")
</pallas_src>

<mosaic_0001>
module attributes {stable_mosaic.version = 11 : i64} {
  func.func @bilinear_resize_kernel(%arg0: i32, %arg1: i32, %arg2: memref<1x4x16x16xf32, #tpu.memory_space<vmem>>, %arg3: memref<32x16xf32, #tpu.memory_space<vmem>>, %arg4: memref<16x32xf32, #tpu.memory_space<vmem>>, %arg5: memref<1x32x128xf32, #tpu.memory_space<vmem>>) attributes {dimension_semantics = [#tpu.dimension_semantics<parallel>, #tpu.dimension_semantics<parallel>], iteration_bounds = array<i64: 2, 1>, scalar_prefetch = 0 : i64, scratch_operands = 0 : i64, tpu.core_type = #tpu.core_type<tc>, window_params = [{transform_indices = @transform_0, window_bounds = array<i64: 1, 4, 16, 16>}, {pipeline_mode = #tpu.pipeline_mode<synchronous>, transform_indices = @transform_1, window_bounds = array<i64: 32, 16>}, {pipeline_mode = #tpu.pipeline_mode<synchronous>, transform_indices = @transform_2, window_bounds = array<i64: 16, 32>}, {transform_indices = @transform_3, window_bounds = array<i64: 1, 32, 128>}]} {
    %c32_i32 = arith.constant 32 : i32
    %0 = arith.muli %arg1, %c32_i32 : i32
    %1 = tpu.assume_multiple %0, 32 : i32
    %2 = arith.index_cast %1 : i32 to index
    %c0 = arith.constant 0 : index
    %3 = vector.load %arg3[%2, %c0] : memref<32x16xf32, #tpu.memory_space<vmem>>, vector<32x16xf32>
    %c0_0 = arith.constant 0 : index
    %c0_1 = arith.constant 0 : index
    %4 = vector.load %arg4[%c0_0, %c0_1] : memref<16x32xf32, #tpu.memory_space<vmem>>, vector<16x32xf32>
    %c0_2 = arith.constant 0 : index
    %c0_3 = arith.constant 0 : index
    %c0_4 = arith.constant 0 : index
    %c0_5 = arith.constant 0 : index
    %5 = vector.load %arg2[%c0_2, %c0_3, %c0_4, %c0_5] : memref<1x4x16x16xf32, #tpu.memory_space<vmem>>, vector<1x1x16x16xf32>
    %6 = vector.shape_cast %5 : vector<1x1x16x16xf32> to vector<16x16xf32>
    %cst = arith.constant dense<0.000000e+00> : vector<32x16xf32>
    %7 = tpu.matmul %3, %6, %cst {dimension_numbers = #tpu.dot_dimension_numbers<[1], [0], [0], [1], [0, 0, 1, 1], [], []>} : vector<32x16xf32>, vector<16x16xf32>, vector<32x16xf32> -> vector<32x16xf32>
    %cst_6 = arith.constant dense<0.000000e+00> : vector<32x32xf32>
    %8 = tpu.matmul %7, %4, %cst_6 {dimension_numbers = #tpu.dot_dimension_numbers<[1], [0], [0], [1], [0, 0, 1, 1], [], []>} : vector<32x16xf32>, vector<16x32xf32>, vector<32x32xf32> -> vector<32x32xf32>
    %c0_7 = arith.constant 0 : index
    %c0_8 = arith.constant 0 : index
    %c0_9 = arith.constant 0 : index
    %9 = vector.load %arg5[%c0_7, %c0_8, %c0_9] : memref<1x32x128xf32, #tpu.memory_space<vmem>>, vector<1x32x32xf32>
    %10 = vector.shape_cast %9 : vector<1x32x32xf32> to vector<32x32xf32>
    %11 = vector.shape_cast %8 : vector<32x32xf32> to vector<1x32x32xf32>
    tpu.vector_store %arg5[%c0_7, %c0_8, %c0_9], %11 {strides = array<i32>} : memref<1x32x128xf32, #tpu.memory_space<vmem>>, vector<1x32x32xf32>,
    %c0_10 = arith.constant 0 : index
    %c1 = arith.constant 1 : index
    %c0_11 = arith.constant 0 : index
    %c0_12 = arith.constant 0 : index
    %12 = vector.load %arg2[%c0_10, %c1, %c0_11, %c0_12] : memref<1x4x16x16xf32, #tpu.memory_space<vmem>>, vector<1x1x16x16xf32>
    %13 = vector.shape_cast %12 : vector<1x1x16x16xf32> to vector<16x16xf32>
    %cst_13 = arith.constant dense<0.000000e+00> : vector<32x16xf32>
    %14 = tpu.matmul %3, %13, %cst_13 {dimension_numbers = #tpu.dot_dimension_numbers<[1], [0], [0], [1], [0, 0, 1, 1], [], []>} : vector<32x16xf32>, vector<16x16xf32>, vector<32x16xf32> -> vector<32x16xf32>
    %cst_14 = arith.constant dense<0.000000e+00> : vector<32x32xf32>
    %15 = tpu.matmul %14, %4, %cst_14 {dimension_numbers = #tpu.dot_dimension_numbers<[1], [0], [0], [1], [0, 0, 1, 1], [], []>} : vector<32x16xf32>, vector<16x32xf32>, vector<32x32xf32> -> vector<32x32xf32>
    %c0_15 = arith.constant 0 : index
    %c0_16 = arith.constant 0 : index
    %c32 = arith.constant 32 : index
    %16 = vector.load %arg5[%c0_15, %c0_16, %c32] : memref<1x32x128xf32, #tpu.memory_space<vmem>>, vector<1x32x32xf32>
    %17 = vector.shape_cast %16 : vector<1x32x32xf32> to vector<32x32xf32>
    %18 = vector.shape_cast %15 : vector<32x32xf32> to vector<1x32x32xf32>
    tpu.vector_store %arg5[%c0_15, %c0_16, %c32], %18 {strides = array<i32>} : memref<1x32x128xf32, #tpu.memory_space<vmem>>, vector<1x32x32xf32>,
    %c0_17 = arith.constant 0 : index
    %c2 = arith.constant 2 : index
    %c0_18 = arith.constant 0 : index
    %c0_19 = arith.constant 0 : index
    %19 = vector.load %arg2[%c0_17, %c2, %c0_18, %c0_19] : memref<1x4x16x16xf32, #tpu.memory_space<vmem>>, vector<1x1x16x16xf32>
    %20 = vector.shape_cast %19 : vector<1x1x16x16xf32> to vector<16x16xf32>
    %cst_20 = arith.constant dense<0.000000e+00> : vector<32x16xf32>
    %21 = tpu.matmul %3, %20, %cst_20 {dimension_numbers = #tpu.dot_dimension_numbers<[1], [0], [0], [1], [0, 0, 1, 1], [], []>} : vector<32x16xf32>, vector<16x16xf32>, vector<32x16xf32> -> vector<32x16xf32>
    %cst_21 = arith.constant dense<0.000000e+00> : vector<32x32xf32>
    %22 = tpu.matmul %21, %4, %cst_21 {dimension_numbers = #tpu.dot_dimension_numbers<[1], [0], [0], [1], [0, 0, 1, 1], [], []>} : vector<32x16xf32>, vector<16x32xf32>, vector<32x32xf32> -> vector<32x32xf32>
    %c0_22 = arith.constant 0 : index
    %c0_23 = arith.constant 0 : index
    %c64 = arith.constant 64 : index
    %23 = vector.load %arg5[%c0_22, %c0_23, %c64] : memref<1x32x128xf32, #tpu.memory_space<vmem>>, vector<1x32x32xf32>
    %24 = vector.shape_cast %23 : vector<1x32x32xf32> to vector<32x32xf32>
    %25 = vector.shape_cast %22 : vector<32x32xf32> to vector<1x32x32xf32>
    tpu.vector_store %arg5[%c0_22, %c0_23, %c64], %25 {strides = array<i32>} : memref<1x32x128xf32, #tpu.memory_space<vmem>>, vector<1x32x32xf32>,
    %c0_24 = arith.constant 0 : index
    %c3 = arith.constant 3 : index
    %c0_25 = arith.constant 0 : index
    %c0_26 = arith.constant 0 : index
    %26 = vector.load %arg2[%c0_24, %c3, %c0_25, %c0_26] : memref<1x4x16x16xf32, #tpu.memory_space<vmem>>, vector<1x1x16x16xf32>
    %27 = vector.shape_cast %26 : vector<1x1x16x16xf32> to vector<16x16xf32>
    %cst_27 = arith.constant dense<0.000000e+00> : vector<32x16xf32>
    %28 = tpu.matmul %3, %27, %cst_27 {dimension_numbers = #tpu.dot_dimension_numbers<[1], [0], [0], [1], [0, 0, 1, 1], [], []>} : vector<32x16xf32>, vector<16x16xf32>, vector<32x16xf32> -> vector<32x16xf32>
    %cst_28 = arith.constant dense<0.000000e+00> : vector<32x32xf32>
    %29 = tpu.matmul %28, %4, %cst_28 {dimension_numbers = #tpu.dot_dimension_numbers<[1], [0], [0], [1], [0, 0, 1, 1], [], []>} : vector<32x16xf32>, vector<16x32xf32>, vector<32x32xf32> -> vector<32x32xf32>
    %c0_29 = arith.constant 0 : index
    %c0_30 = arith.constant 0 : index
    %c96 = arith.constant 96 : index
    %30 = vector.load %arg5[%c0_29, %c0_30, %c96] : memref<1x32x128xf32, #tpu.memory_space<vmem>>, vector<1x32x32xf32>
    %31 = vector.shape_cast %30 : vector<1x32x32xf32> to vector<32x32xf32>
    %32 = vector.shape_cast %29 : vector<32x32xf32> to vector<1x32x32xf32>
    tpu.vector_store %arg5[%c0_29, %c0_30, %c96], %32 {strides = array<i32>} : memref<1x32x128xf32, #tpu.memory_space<vmem>>, vector<1x32x32xf32>,
    return
  }
  func.func @transform_0(%arg0: i32, %arg1: i32) -> (i32, i32, i32, i32) {
    %c0_i32 = arith.constant 0 : i32
    %c0_i32_0 = arith.constant 0 : i32
    %c0_i32_1 = arith.constant 0 : i32
    %c0_i32_2 = arith.constant 0 : i32
    return %arg0, %c0_i32, %c0_i32_0, %c0_i32_1 : i32, i32, i32, i32
  }
  func.func @transform_1(%arg0: i32, %arg1: i32) -> (i32, i32) {
    %c0_i32 = arith.constant 0 : i32
    %c0_i32_0 = arith.constant 0 : i32
    %c0_i32_1 = arith.constant 0 : i32
    return %c0_i32, %c0_i32_0 : i32, i32
  }
  func.func @transform_2(%arg0: i32, %arg1: i32) -> (i32, i32) {
    %c0_i32 = arith.constant 0 : i32
    %c0_i32_0 = arith.constant 0 : i32
    %c0_i32_1 = arith.constant 0 : i32
    return %c0_i32, %c0_i32_0 : i32, i32
  }
  func.func @transform_3(%arg0: i32, %arg1: i32) -> (i32, i32, i32) {
    %c0_i32 = arith.constant 0 : i32
    %c0_i32_0 = arith.constant 0 : i32
    return %arg0, %arg1, %c0_i32 : i32, i32, i32
  }
}

</mosaic_0001>

<bundles_post_ra>
// kernel: tpu_custom_call.1
= control target key start
LH: loop header
LB: loop body
LE: loop exit
PB: predicated region body
PF: predicated region fallthrough
CT: control target
= control target key end

     0   :  { %8 = vsyncpa [#allocation3], 0  ;;  %s1751_s0 = inlined_call_operand.hbm [shape: f32[2,4,16,16], index: 0, kind: input, shape index: {}]   ;;  %s1752_s1 = inlined_call_operand.vmem [shape: f32[32,16], index: 1, kind: input, shape index: {}]   ;;  %s1753_s2 = inlined_call_operand.vmem [shape: f32[16,32], index: 2, kind: input, shape index: {}]   ;;  %s1754_s3 = inlined_call_operand.hbm [shape: f32[2,32,128], index: 3, kind: output, shape index: {}]  }
   0x1   :  { %10 = vsyncpa [#allocation3 + $0x1], 0 }
   0x2   :  { %11 = vsyncpa [#allocation4], 0 }
   0x3   :  { %13 = vsyncpa [#allocation4 + $0x1], 0  ;;  %s1525_s12 = smov 0   ;;  %s1527_s13 = smov 0  }
   0x4   :  { %s1529_s14 = smov 0   ;;  %s1531_s15 = smov 0  }
   0x5   :  { %s1533_s16 = smov 0   ;;  %s1535_s17 = smov 0  }
   0x6 LB: > { %s1134_s18 = sadd.s32 4294967295, %s1494_s17   ;;  %s1135_s19 = sadd.s32 4294967294, %s1494_s17   ;;  %s1494_s17 = sphi %s1535_s17, %s19_s17   ;;  %s1490_s16 = sphi %s1533_s16, %s1765_s16   ;;  %s1486_s15 = sphi %s1531_s15, %s1764_s15   ;;  %s1482_s14 = sphi %s1529_s14, %s1763_s14   ;;  %s1478_s13 = sphi %s1527_s13, %s1762_s13   ;;  %s1474_s12 = sphi %s1525_s12, %s1761_s12  }
   0x7   : > { %s31_s20 = sadd.s32 1, %s1490_s16  ;;  %s38_s21 = sadd.s32 1, %s1482_s14 }
   0x8   : > { %p33_p0 = scmp.ge.s32.totalorder %s31_s20, 2  ;;  %p45_p1 = scmp.ne.s32.totalorder %s1482_s14, %s1478_s13 }
   0x9   : > { %p46_p2 = scmp.eq.s32.totalorder %s1494_s17, 0  ;;  %p51_p3 = scmp.ne.s32.totalorder %s1478_s13, %s1474_s12 }
   0xa   : > { %s1767_s20 = smov (%p33_p0, %s31_s20), 0  ;;  %p52_p5 = scmp.eq.s32.totalorder %s1134_s18, 0 }
   0xb   : > { %p1566_p4 = por %p46_p2, %p45_p1  ;;  %s35_s23 = ssub.s32 %s1490_s16, %s1767_s20 }
   0xc   : > { %p119_p6 = scmp.eq.s32.totalorder %s1134_s18, 1  ;;  %p36_p7 = scmp.eq.s32.totalorder %s35_s23, 0 }
   0xd   : > { %p1572_p8 = por %p52_p5, %p51_p3  ;;  %p125_p10 = scmp.eq.s32.totalorder %s1135_s19, 1 }
   0xe   : > { %p1576_p9 = por %p119_p6, %p45_p1  ;;  %p1329_p13 = scmp.lt.s32.totalorder %s1494_s17, 2 }
   0xf   : > { %s1581_s26 = scalar_select %p36_p7, %s1482_s14, %s38_s21  }
  0x10   : > { %p1583_p11 = por %p125_p10, %p51_p3  ;;  %s151_s28 = sand.u32 1, %s1482_s14  }
  0x11   : > { %s1138_s29 = sshll.u32 %s151_s28, 6  ;;  %s1187_s30 = sshll.u32 %s1490_s16, 10 }
  0x12   : > { %s161_s6 = scalar_lea.hbm %s1751_s0, %s1187_s30  ;;  %s155_s7 = scalar_lea.vmem [#allocation2], %s1138_s29 }
  0x13   : > { %s162_s8 = sshll.u32 %s155_s7, 4  ;;  %p1596_p0 = pnand %p1329_p13, %p1566_p4  ;;  %s163_s8 = int_to_ptr.vmem [resolvable:$true] %s162_s8 }
  0x14   : > { %p1141_p1 = scmp.ge.s32.totalorder %s1494_s17, 1  ;;  %s152_s10 = scalar_lea.sflag [#allocation3], %s151_s28 }
  0x15   : > { %p1388_p2 = pneg %p1596_p0  ;;  %s1399_s11 = scalar_lea.vmem %s163_s8, 1024 }
  0x16   : > { %p1400_p3 = scmp.ne.s32.totalorder %s163_s8, %s1399_s11  ;;  %s1496_s18 = smov [#allocation2]  }
  0x17   : > { %s1404_s19 = sshll.u32 %s1496_s18, 4  ;;  %s1405_s19 = int_to_ptr.vmem [resolvable:$false] %s1404_s19 }
  0x18   : > { %p1402_p5 = pnand %p1400_p3, %p1388_p2  ;;  %s1406_s21 = scalar_lea.vmem %s1405_s19, 2048 }
  0x19   : > { %p1407_p7 = scmp.lt.s32.totalorder %s163_s8, %s1405_s19  ;;  %p1408_p10 = scmp.lt.s32.totalorder %s1406_s21, %s1399_s11 }
  0x1a   : > { %p1403_p6 = pneg %p1402_p5 }
  0x1b   : > { %p1409_p12 = por %p1408_p10, %p1407_p7 }
  0x1d   : > { %p1410_p4 = pnand %p1409_p12, %p1403_p6 }
  0x1f   : > { %1413 = shalt.err (!%p1410_p4)
}
  0x20   : > { %s1497_s22 = smov 128   ;;  %s1498_s23 = smov 8  }
  0x21   : > { %1324 = dma.hbm_to_vmem [thread:$0]  (!%p1596_p0), %s161_s6, 1024, %s163_s8, %s152_s10, %s1497_s22, %s1497_s22, %s1498_s23  }
  0x22   : > { %p170_p13 = scmp.lt.s32.totalorder %s1494_s17, 3 }
  0x24   : > { %p171_p2 = pnand %p1141_p1, %p170_p13 }
  0x25   : > { %s1609_s28 = sand.u32 (!%p171_p2), 1, %s1478_s13  }
  0x26   : > { %174 = sbr.rel (%p171_p2) target bundleno = 599 (0x257), region = 32  ;;  %s1142_s29 = sshll.u32 (!%p171_p2), %s1609_s28, 6 }
  0x27   : > { %s177_s30 = scalar_lea.sflag (!%p171_p2), [#allocation3], %s1609_s28  ;;  %s1613_s4 = scalar_lea.vmem (!%p171_p2), [#allocation2], %s1142_s29 }
  0x2b   : > { %1465 = dma.done.wait (%p1572_p8), %s177_s30, 1024  }
  0x2c   : > { %1467 = vsyncadd (%p1572_p8), %s177_s30, 4294966272  ;;  %vm214_vm0 = vcmask 130048   ;;  %v213_v0 = vld [vmem:[%s1613_s4 + $0x8] sm:$0xff]  ;;  %v212_v1 = vld [vmem:[%s1613_s4] sm:$0xff]  ;;  %s1143_s23 = sshll.u32 %s1609_s28, 5  ;;  %vm409_vm1 = vcmask 261120  }
  0x2d   : > { %v206_v2 = vld [vmem:[%s1752_s1] sm:$0xff]  ;;  %1237 = vmatprep.subr.mxu0 %v213_v0  ;;  %v207_v3 = vld [vmem:[%s1752_s1 + $0x8] sm:$0xff]  ;;  %v1153_v4 = vld [vmem:[%s1613_s4 + $0x18] sm:$0xff]  ;;  %s1678_s29 = scalar_lea.vmem [#allocation5], %s1143_s23  ;;  %s1499_s30 = smov 32   ;;  %vm615_vm2 = vcmask 523520  }
  0x2e   : > { %1241 = vmatprep.mubr.msk.f32.mxu0 %vm214_vm0, %v206_v2  ;;  %1238 = vmatpush3.msra.mxu0 %v213_v0  ;;  %v208_v5 = vld [vmem:[%s1752_s1 + $0x10] sm:$0xff]  ;;  %v209_v7 = vld [vmem:[%s1752_s1 + $0x18] sm:$0xff]  ;;  %v1163_v8 = vld [vmem:[%s1613_s4 + $0x28] sm:$0xff]  ;;  %s1501_s5 = smov 96   ;;  %vm821_vm3 = vcmask 785920   ;;  %vm1027_vm4 = vcmask 1048320  }
  0x2f   : > { %1239 = vmatprep.subr.mxu0 %v212_v1  ;;  %v1152_v6 = vld [vmem:[%s1613_s4 + $0x10] sm:$0xff]  ;;  %v1162_v9 = vld [vmem:[%s1613_s4 + $0x20] sm:$0xff]  ;;  %v1173_v10 = vld [vmem:[%s1613_s4 + $0x38] sm:$0xff]  ;;  %s1188_s6 = sshll.u32 %s1486_s15, 9  ;;  %s1048_s7 = sshll.u32 %s1678_s29, 4  ;;  %s1701_s7 = int_to_ptr.vmem [resolvable:$true] %s1048_s7 }
  0x30   : > { %1240 = vmatpush3.msra.mxu0 %v212_v1  ;;  %v1172_v11 = vld [vmem:[%s1613_s4 + $0x30] sm:$0xff]  ;;  %v211_v12 = vld [vmem:[%s1753_s2 + $0x8] sm:$0xff]  ;;  %v210_v13 = vld [vmem:[%s1753_s2] sm:$0xff]  ;;  %s1500_s4 = smov 64   ;;  %s1699_s9 = scalar_lea.hbm %s1754_s3, %s1188_s6 }
  0x31   : > { %1242 = vmatmul.mubr.msk.f32.vlgmr.msra.gmra.mxu0 %vm214_vm0, %v207_v3  ;;  %1257 = vmatprep.subr.mxu0 %v1153_v4  ;;  %s1033_s10 = scalar_lea.sflag [#allocation4], %s1609_s28  ;;  %s1414_s11 = scalar_lea.vmem %s1701_s7, 512 }
  0x32   : > { %1258 = vmatpush3.msra.mxu0 %v1153_v4  ;;  %1244 = vmatprep.mubr.msk.f32.mxu0 %vm214_vm0, %v208_v5  ;;  %p1415_p8 = scmp.ne.s32.totalorder %s1701_s7, %s1414_s11  ;;  %s1502_s15 = smov [#allocation5]  }
  0x33   : > { %1259 = vmatprep.subr.mxu0 %v1152_v6  ;;  %1247 = vmatprep.subr.mxu1 %v211_v12  ;;  %s1418_s18 = sshll.u32 %s1502_s15, 4  ;;  %s1419_s18 = int_to_ptr.vmem [resolvable:$false] %s1418_s18 }
  0x34   : > { %1260 = vmatpush3.msra.mxu0 %v1152_v6  ;;  %1248 = vmatpush3.msra.mxu1 %v211_v12  ;;  %p1416_p12 = pnand %p1415_p8, %p1576_p9  ;;  %s1420_s19 = scalar_lea.vmem %s1419_s18, 1024 }
  0x35   : > { %1245 = vmatmul.mubr.msk.f32.gmra.mxu0 %vm214_vm0, %v209_v7  ;;  %1277 = vmatprep.subr.mxu0 %v1163_v8  ;;  %p1421_p1 = scmp.lt.s32.totalorder %s1701_s7, %s1419_s18  ;;  %p1422_p3 = scmp.lt.s32.totalorder %s1420_s19, %s1414_s11 }
  0x36   : > { %1261 = vmatprep.mubr.msk.f32.mxu0 %vm214_vm0, %v206_v2  ;;  %1249 = vmatprep.subr.mxu1 %v210_v13  ;;  %p1417_p0 = pneg %p1416_p12 }
  0x37   : > { %1250 = vmatpush3.msra.mxu1 %v210_v13  ;;  %p1423_p5 = por %p1422_p3, %p1421_p1 }
  0x38   : > { %1267 = vmatprep.subr.mxu1 %v211_v12 }
  0x39   : > { %1262 = vmatmul.mubr.msk.f32.vlgmr.msra.gmra.mxu0 %vm214_vm0, %v207_v3  ;;  %p1424_p6 = pnand %p1423_p5, %p1417_p0 }
  0x3a   : > { %1264 = vmatprep.mubr.msk.f32.mxu0 %vm214_vm0, %v208_v5  ;;  %1278 = vmatpush3.msra.mxu0 %v1163_v8 }
  0x3b   : > { %1279 = vmatprep.subr.mxu0 %v1162_v9 }
  0x3c   : > { %1280 = vmatpush3.msra.mxu0 %v1162_v9 }
  0x3d   : > { %1265 = vmatmul.mubr.msk.f32.gmra.mxu0 %vm214_vm0, %v209_v7  ;;  %1297 = vmatprep.subr.mxu0 %v1173_v10 }
  0x3e   : > { %1281 = vmatprep.mubr.msk.f32.mxu0 %vm214_vm0, %v206_v2 }
  0x41   : > { %1282 = vmatmul.mubr.msk.f32.vlgmr.msra.gmra.mxu0 %vm214_vm0, %v207_v3 }
  0x42   : > { %1284 = vmatprep.mubr.msk.f32.mxu0 %vm214_vm0, %v208_v5  ;;  %1298 = vmatpush3.msra.mxu0 %v1173_v10 }
  0x43   : > { %1299 = vmatprep.subr.mxu0 %v1172_v11 }
  0x44   : > { %1300 = vmatpush3.msra.mxu0 %v1172_v11 }
  0x45   : > { %1285 = vmatmul.mubr.msk.f32.gmra.mxu0 %vm214_vm0, %v209_v7 }
  0x46   : > { %1301 = vmatprep.mubr.msk.f32.mxu0 %vm214_vm0, %v206_v2 }
  0x49   : > { %1302 = vmatmul.mubr.msk.f32.vlgmr.msra.gmra.mxu0 %vm214_vm0, %v207_v3 }
  0x4a   : > { %1304 = vmatprep.mubr.msk.f32.mxu0 %vm214_vm0, %v208_v5 }
  0x4d   : > { %1305 = vmatmul.mubr.msk.f32.gmra.mxu0 %vm214_vm0, %v209_v7 }
  0xf1   : > { %v1243_v14 = vpop.f32.mrf.mxu0 }
  0xf3   : > { %v293_v15 = vpop.f32.mrf.mxu0 }
  0xf4   : > { %1251 = vmatprep.mubr.msk.f32.mxu1 %vm214_vm0, %v293_v15 }
  0xf5   : > { %v1246_v16 = vpop.f32.mrf.mxu0  ;;  %1252 = vmatmul.mubr.msk.f32.vlgmr.msra.gmra.mxu1 %vm214_vm0, %v1243_v14 }
  0xf6   : > { %1268 = vmatpush3.msra.mxu1 %v211_v12 }
  0xf7   : > { %v303_v17 = vpop.f32.mrf.mxu0  ;;  %1269 = vmatprep.subr.mxu1 %v210_v13 }
  0xf8   : > { %1254 = vmatprep.mubr.msk.f32.mxu1 %vm214_vm0, %v303_v17  ;;  %1270 = vmatpush3.msra.mxu1 %v210_v13 }
  0xf9   : > { %1255 = vmatmul.mubr.msk.f32.gmra.mxu1 %vm214_vm0, %v1246_v16  ;;  %v1263_v18 = vpop.f32.mrf.mxu0  ;;  %1287 = vmatprep.subr.mxu1 %v211_v12 }
  0xfb   : > { %v483_v19 = vpop.f32.mrf.mxu0 }
  0xfc   : > { %1271 = vmatprep.mubr.msk.f32.mxu1 %vm214_vm0, %v483_v19 }
  0xfd   : > { %v1266_v20 = vpop.f32.mrf.mxu0  ;;  %1272 = vmatmul.mubr.msk.f32.vlgmr.msra.gmra.mxu1 %vm214_vm0, %v1263_v18 }
  0xfe   : > { %1288 = vmatpush3.msra.mxu1 %v211_v12 }
  0xff   : > { %v493_v21 = vpop.f32.mrf.mxu0  ;;  %1289 = vmatprep.subr.mxu1 %v210_v13 }
 0x100   : > { %1274 = vmatprep.mubr.msk.f32.mxu1 %vm214_vm0, %v493_v21  ;;  %1290 = vmatpush3.msra.mxu1 %v210_v13 }
 0x101   : > { %1275 = vmatmul.mubr.msk.f32.gmra.mxu1 %vm214_vm0, %v1266_v20  ;;  %v1283_v22 = vpop.f32.mrf.mxu0  ;;  %1307 = vmatprep.subr.mxu1 %v211_v12 }
 0x103   : > { %v689_v23 = vpop.f32.mrf.mxu0 }
 0x104   : > { %1291 = vmatprep.mubr.msk.f32.mxu1 %vm214_vm0, %v689_v23 }
 0x105   : > { %v1286_v24 = vpop.f32.mrf.mxu0  ;;  %1292 = vmatmul.mubr.msk.f32.vlgmr.msra.gmra.mxu1 %vm214_vm0, %v1283_v22 }
 0x106   : > { %1308 = vmatpush3.msra.mxu1 %v211_v12 }
 0x107   : > { %v699_v25 = vpop.f32.mrf.mxu0  ;;  %1309 = vmatprep.subr.mxu1 %v210_v13 }
 0x108   : > { %1294 = vmatprep.mubr.msk.f32.mxu1 %vm214_vm0, %v699_v25  ;;  %1310 = vmatpush3.msra.mxu1 %v210_v13 }
 0x109   : > { %1295 = vmatmul.mubr.msk.f32.gmra.mxu1 %vm214_vm0, %v1286_v24  ;;  %v1303_v26 = vpop.f32.mrf.mxu0 }
 0x10b   : > { %v895_v27 = vpop.f32.mrf.mxu0 }
 0x10c   : > { %1311 = vmatprep.mubr.msk.f32.mxu1 %vm214_vm0, %v895_v27 }
 0x10d   : > { %v1306_v28 = vpop.f32.mrf.mxu0  ;;  %1312 = vmatmul.mubr.msk.f32.vlgmr.msra.gmra.mxu1 %vm214_vm0, %v1303_v26 }
 0x10f   : > { %v905_v29 = vpop.f32.mrf.mxu0 }
 0x110   : > { %1314 = vmatprep.mubr.msk.f32.mxu1 %vm214_vm0, %v905_v29 }
 0x111   : > { %1315 = vmatmul.mubr.msk.f32.gmra.mxu1 %vm214_vm0, %v1306_v28 }
 0x1b5   : > { %v1253_v30 = vpop.f32.mrf.mxu1 }
 0x1b6   : > { %411 = vst.msk [vmem:[%s1678_s29 + $0x8] sm:$0xff] %vm409_vm1, %v1253_v30 }
 0x1b7   : > { %v390_v31 = vpop.f32.mrf.mxu1 }
 0x1b8   : > { %410 = vst.msk [vmem:[%s1678_s29] sm:$0xff] %vm409_vm1, %v390_v31 }
 0x1b9   : > { %v1256_v32 = vpop.f32.mrf.mxu1 }
 0x1ba   : > { %413 = vst.msk [vmem:[%s1678_s29 + $0x18] sm:$0xff] %vm409_vm1, %v1256_v32 }
 0x1bb   : > { %v400_v33 = vpop.f32.mrf.mxu1 }
 0x1bc   : > { %412 = vst.msk [vmem:[%s1678_s29 + $0x10] sm:$0xff] %vm409_vm1, %v400_v33 }
 0x1bd   : > { %v1273_v34 = vpop.f32.mrf.mxu1 }
 0x1be   : > { %605 = vrot.lane.b32.xlu0 %v1273_v34, %s1499_s30 }
 0x1bf   : > { %v580_v35 = vpop.f32.mrf.mxu1 }
 0x1c1   : > { %v1276_v36 = vpop.f32.mrf.mxu1 }
 0x1c2   : > { %603 = vrot.lane.b32.xlu0 %v580_v35, %s1499_s30  ;;  %609 = vrot.lane.b32.xlu1 %v1276_v36, %s1499_s30 }
 0x1c3   : > { %v590_v37 = vpop.f32.mrf.mxu1 }
 0x1c5   : > { %v1293_v38 = vpop.f32.mrf.mxu1 }
 0x1c6   : > { %607 = vrot.lane.b32.xlu1 %v590_v37, %s1499_s30 }
 0x1c7   : > { %v786_v39 = vpop.f32.mrf.mxu1 }
 0x1c8   : > { %809 = vrot.lane.b32.xlu0 %v786_v39, %s1500_s4 }
 0x1c9   : > { %v1296_v40 = vpop.f32.mrf.mxu1 }
 0x1ca   : > { %811 = vrot.lane.b32.xlu1 %v1293_v38, %s1500_s4 }
 0x1cb   : > { %v796_v41 = vpop.f32.mrf.mxu1 }
 0x1cc   : > { %813 = vrot.lane.b32.xlu0 %v796_v41, %s1500_s4 }
 0x1cd   : > { %v1313_v42 = vpop.f32.mrf.mxu1 }
 0x1ce   : > { %815 = vrot.lane.b32.xlu1 %v1296_v40, %s1500_s4 }
 0x1cf   : > { %v992_v43 = vpop.f32.mrf.mxu1 }
 0x1d0   : > { %1015 = vrot.lane.b32.xlu0 %v992_v43, %s1501_s5 }
 0x1d1   : > { %v1316_v44 = vpop.f32.mrf.mxu1 }
 0x1d2   : > { %1017 = vrot.lane.b32.xlu1 %v1313_v42, %s1501_s5 }
 0x1d3   : > { %v1002_v45 = vpop.f32.mrf.mxu1 }
 0x1d4   : > { %1019 = vrot.lane.b32.xlu0 %v1002_v45, %s1501_s5 }
 0x1d6   : > { %1021 = vrot.lane.b32.xlu1 %v1316_v44, %s1501_s5 }
 0x230   : > { %v606_v46 = vpop.permute.xlu0 %605 }
 0x231   : > { %617 = vst.msk [vmem:[%s1678_s29 + $0x8] sm:$0xff] %vm615_vm2, %v606_v46 }
 0x234   : > { %v604_v47 = vpop.permute.xlu0 %603  ;;  %v610_v48 = vpop.permute.xlu1 %609 }
 0x235   : > { %616 = vst.msk [vmem:[%s1678_s29] sm:$0xff] %vm615_vm2, %v604_v47  ;;  %619 = vst.msk [vmem:[%s1678_s29 + $0x18] sm:$0xff] %vm615_vm2, %v610_v48 }
 0x238   : > { %v608_v49 = vpop.permute.xlu1 %607 }
 0x239   : > { %618 = vst.msk [vmem:[%s1678_s29 + $0x10] sm:$0xff] %vm615_vm2, %v608_v49 }
 0x23a   : > { %v810_v50 = vpop.permute.xlu0 %809 }
 0x23b   : > { %822 = vst.msk [vmem:[%s1678_s29] sm:$0xff] %vm821_vm3, %v810_v50 }
 0x23c   : > { %v812_v51 = vpop.permute.xlu1 %811 }
 0x23d   : > { %823 = vst.msk [vmem:[%s1678_s29 + $0x8] sm:$0xff] %vm821_vm3, %v812_v51 }
 0x23e   : > { %v814_v52 = vpop.permute.xlu0 %813 }
 0x23f   : > { %824 = vst.msk [vmem:[%s1678_s29 + $0x10] sm:$0xff] %vm821_vm3, %v814_v52 }
 0x240   : > { %v816_v53 = vpop.permute.xlu1 %815 }
 0x241   : > { %825 = vst.msk [vmem:[%s1678_s29 + $0x18] sm:$0xff] %vm821_vm3, %v816_v53 }
 0x242   : > { %v1016_v54 = vpop.permute.xlu0 %1015 }
 0x243   : > { %1028 = vst.msk [vmem:[%s1678_s29] sm:$0xff] %vm1027_vm4, %v1016_v54 }
 0x244   : > { %v1018_v55 = vpop.permute.xlu1 %1017 }
 0x245   : > { %1029 = vst.msk [vmem:[%s1678_s29 + $0x8] sm:$0xff] %vm1027_vm4, %v1018_v55 }
 0x246   : > { %v1020_v56 = vpop.permute.xlu0 %1019 }
 0x247   : > { %1030 = vst.msk [vmem:[%s1678_s29 + $0x10] sm:$0xff] %vm1027_vm4, %v1020_v56 }
 0x248   : > { %v1022_v57 = vpop.permute.xlu1 %1021 }
 0x249   : > { %1031 = vst.msk [vmem:[%s1678_s29 + $0x18] sm:$0xff] %vm1027_vm4, %v1022_v57 }
 0x24a   : > { %1427 = shalt.err (!%p1424_p6)
}
 0x24b   : > { %s1428_s21 = scalar_lea.hbm %s1699_s9, 512  ;;  %s1432_s29 = scalar_lea.hbm %s1754_s3, 1024 }
 0x24c   : > { %p1429_p7 = scmp.ne.s32.totalorder %s1699_s9, %s1428_s21  ;;  %p1433_p13 = scmp.lt.s32.totalorder %s1699_s9, %s1754_s3 }
 0x24d   : > { %p1434_p2 = scmp.lt.s32.totalorder %s1432_s29, %s1428_s21 }
 0x24e   : > { %p1430_p10 = pnand %p1429_p7, %p1576_p9 }
 0x24f   : > { %p1435_p8 = por %p1434_p2, %p1433_p13 }
 0x250   : > { %p1431_p4 = pneg %p1430_p10 }
 0x252   : > { %p1436_p12 = pnand %p1435_p8, %p1431_p4 }
 0x254   : > { %1439 = shalt.err (!%p1436_p12)
}
 0x255   : > { %s1503_s5 = smov 128   ;;  %s1504_s6 = smov 8  }
 0x256   : > { %1319 = dma.vmem_to_hbm [thread:$0]  (%p1576_p9), %s1701_s7, 512, %s1699_s9, %s1033_s10, %s1503_s5, %s1503_s5, %s1504_s6  }
 0x257 PF: > { %s1063_s8 = sand.u32 1, %s1474_s12   ;;  %p1760_p0 = scmp.ge.s32.totalorder %s1494_s17, 2 }
 0x258   : > { %s1064_s24 = scalar_lea.sflag [#allocation4], %s1063_s8 }
 0x259   : > { %p1326_p1 = pnand %p1760_p0, %p1583_p11 }
 0x25b   : > { %p1327_p3 = pneg %p1326_p1 }
 0x25d   : > { %1469 = dma.done.wait (%p1327_p3), %s1064_s24, 512  }
 0x25e   : > { %1471 = vsyncadd (%p1327_p3), %s1064_s24, 4294966784  ;;  %s19_s17 = sadd.s32 1, %s1494_s17   ;;  %s1761_s12 = smov %s1478_s13 }
 0x25f   : > { %p16_p5 = scmp.ge.s32.totalorder %s19_s17, 4   ;;  %s1762_s13 = smov %s1482_s14 }
 0x260   : > { %s1763_s14 = smov %s1581_s26  ;;  %s1764_s15 = smov %s1490_s16 }
 0x261   : > { %s1765_s16 = smov %s1767_s20  ;;  %18 = sbr.rel (!%p16_p5) target bundleno = 6 (0x6), region = 81 }
 0x266   :  { %1069 = vsyncpa [#allocation3], 1 }
 0x267   :  { %1071 = vsyncpa [#allocation3 + $0x1], 1 }
 0x268   :  { %1072 = vsyncpa [#allocation4], 1 }
 0x269   :  { %1074 = vsyncpa [#allocation4 + $0x1], 1 }

</bundles_post_ra>
